<compile_context>
chip_gen: v7x
topology: tpu7x:2x2x1
jax: 0.10.0
libtpu: 0.0.40
codegen_flags: <defaults>
</compile_context>

<pallas_src>
import jax
import jax.numpy as jnp
from jax.experimental import pallas as pl
from jax.experimental.pallas import tpu as pltpu

BN_EPS = 1e-5


def _pick_hw_tile(hw, max_tile=2048):
    """Largest lane tile (multiple of 128) that divides H*W, capped at max_tile."""
    if hw % 128 != 0:
        return hw  # fall back to a full-extent block
    t = min(hw, max_tile)
    while hw % t != 0:
        t -= 128
    return t


def _stats_kernel(x_ref, w1_ref, b1_ref, sum_ref, sumsq_ref):
    # x_ref:   (C, t_hw)   spatial on lanes
    # w1_ref:  (d_ff, C)   b1_ref: (d_ff, 1)
    # sum_ref / sumsq_ref: (d_ff, 1) accumulators resident across the grid
    @pl.when((pl.program_id(0) == 0) & (pl.program_id(1) == 0))
    def _():
        sum_ref[...] = jnp.zeros_like(sum_ref)
        sumsq_ref[...] = jnp.zeros_like(sumsq_ref)

    h = jnp.dot(w1_ref[...], x_ref[...],
                preferred_element_type=jnp.float32) + b1_ref[...]
    # per-channel partial sums: lane reduction -> XLU, f32 accumulation
    sum_ref[...] += jnp.sum(h, axis=-1, keepdims=True)
    sumsq_ref[...] += jnp.sum(h * h, axis=-1, keepdims=True)


def _apply_kernel(x_ref, w1_ref, scale_ref, shift_ref, w2_ref, b2_ref, o_ref):
    # Fused: o = W2 @ relu((W1 @ x) * scale + shift) + b2
    # (b1, BN mean/inv_std and gamma/beta are all folded into scale/shift.)
    h = jnp.dot(w1_ref[...], x_ref[...], preferred_element_type=jnp.float32)
    h = h * scale_ref[...] + shift_ref[...]
    h = jnp.maximum(h, 0.0)
    out = jnp.dot(w2_ref[...], h.astype(w2_ref.dtype),
                  preferred_element_type=jnp.float32) + b2_ref[...]
    o_ref[...] = out.astype(o_ref.dtype)


def position_feedforward_3d(x_nchw, params):
    """x_nchw: (N, d_model, H, W) -> (N, d_model, H, W)."""
    N, C, H, W = x_nchw.shape
    d_ff = params["w1"].shape[0]
    HW = H * W
    M = N * HW

    x3 = x_nchw.reshape(N, C, HW)          # free reshape, no XLA transpose
    t_hw = _pick_hw_tile(HW)
    grid = (N, HW // t_hw)

    # leading `None` squeezes the batch dim out of the kernel ref -> (C, t_hw)
    x_spec = pl.BlockSpec((None, C, t_hw), lambda n, s: (n, 0, s))
    full = lambda shape: pl.BlockSpec(shape, lambda n, s: (0, 0))

    # ---- pass 1: per-channel sum / sum-of-squares of h = W1 @ x + b1 ----
    h_sum, h_sumsq = pl.pallas_call(
        _stats_kernel,
        out_shape=(jax.ShapeDtypeStruct((d_ff, 1), jnp.float32),
                   jax.ShapeDtypeStruct((d_ff, 1), jnp.float32)),
        grid_spec=pltpu.PrefetchScalarGridSpec(
            num_scalar_prefetch=0,
            grid=grid,
            in_specs=[x_spec, full((d_ff, C)), full((d_ff, 1))],
            out_specs=(full((d_ff, 1)), full((d_ff, 1))),
        ),
        compiler_params=pltpu.CompilerParams(
            dimension_semantics=("arbitrary", "arbitrary")),
    )(x3, params["w1"], params["b1"])

    # ---- finalize BN stats (tiny (d_ff, 1) math, off the hot path) ----
    m = jnp.float32(M)
    mean = h_sum / m
    var = jnp.maximum(h_sumsq / m - mean * mean, 0.0)   # biased variance
    inv_std = jax.lax.rsqrt(var + BN_EPS)
    scale = params["gamma"] * inv_std
    shift = (params["b1"] - mean) * scale + params["beta"]

    # ---- pass 2: matmul1 (recompute) + fused BN + ReLU + matmul2 ----
    out3 = pl.pallas_call(
        _apply_kernel,
        out_shape=jax.ShapeDtypeStruct((N, C, HW), x_nchw.dtype),
        grid_spec=pltpu.PrefetchScalarGridSpec(
            num_scalar_prefetch=0,
            grid=grid,
            in_specs=[x_spec, full((d_ff, C)), full((d_ff, 1)),
                      full((d_ff, 1)), full((C, d_ff)), full((C, 1))],
            out_specs=pl.BlockSpec((None, C, t_hw), lambda n, s: (n, 0, s)),
        ),
        compiler_params=pltpu.CompilerParams(
            dimension_semantics=("parallel", "parallel")),
    )(x3, params["w1"], scale, shift, params["w2"], params["b2"])

    return out3.reshape(N, C, H, W)


def init_params(key, d_model, d_ff):
    """Deterministic synthetic parameters (native PyTorch layouts, squeezed).

    Conv2d(d_model, d_ff, 1): weight (d_ff, d_model, 1, 1) -> (d_ff, d_model);
    bias (d_ff,) -> (d_ff, 1).  BatchNorm2d(d_ff): gamma/beta -> (d_ff, 1).
    Conv2d(d_ff, d_model, 1): weight -> (d_model, d_ff); bias -> (d_model, 1).
    """
    k1, k2, k3, k4, k5, k6 = jax.random.split(key, 6)
    s1 = 1.0 / jnp.sqrt(jnp.float32(d_model))
    s2 = 1.0 / jnp.sqrt(jnp.float32(d_ff))
    return {
        "w1": jax.random.uniform(k1, (d_ff, d_model), jnp.float32, -s1, s1),
        "b1": jax.random.uniform(k2, (d_ff, 1), jnp.float32, -s1, s1),
        "gamma": 1.0 + 0.1 * jax.random.normal(k3, (d_ff, 1), jnp.float32),
        "beta": 0.1 * jax.random.normal(k4, (d_ff, 1), jnp.float32),
        "w2": jax.random.uniform(k5, (d_model, d_ff), jnp.float32, -s2, s2),
        "b2": jax.random.uniform(k6, (d_model, 1), jnp.float32, -s2, s2),
    }


def _reference(x_nchw, params):
    """Pure-JAX reference of the same forward pass (training-mode BN)."""
    N, C, H, W = x_nchw.shape
    x = x_nchw.reshape(N, C, H * W).astype(jnp.float32)
    h = jnp.einsum("fc,ncs->nfs", params["w1"], x) + params["b1"][None]
    mean = jnp.mean(h, axis=(0, 2), keepdims=True)
    var = jnp.mean((h - mean) ** 2, axis=(0, 2), keepdims=True)
    h = (h - mean) * jax.lax.rsqrt(var + BN_EPS) * params["gamma"][None] \
        + params["beta"][None]
    h = jnp.maximum(h, 0.0)
    out = jnp.einsum("cf,nfs->ncs", params["w2"], h) + params["b2"][None]
    return out.reshape(N, C, H, W).astype(x_nchw.dtype)


if __name__ == "__main__":
    d_model, d_ff = 4, 32
    N, H, W = 2, 16, 16

    key = jax.random.PRNGKey(0)
    kx, kp = jax.random.split(key)
    x = jax.random.normal(kx, (N, d_model, H, W), jnp.float32)
    params = init_params(kp, d_model, d_ff)

    out = jax.block_until_ready(position_feedforward_3d(x, params))
    ref = _reference(x, params)

    assert out.shape == (N, d_model, H, W)
    assert jnp.allclose(out, ref, atol=1e-4, rtol=1e-4), "mismatch vs reference"

    print("KERNEL_OK")
</pallas_src>

<mosaic_0001>
module attributes {stable_mosaic.version = 11 : i64} {
  func.func @_stats_kernel(%arg0: i32, %arg1: i32, %arg2: memref<1x4x256xf32, #tpu.memory_space<vmem>>, %arg3: memref<32x4xf32, #tpu.memory_space<vmem>>, %arg4: memref<32x1xf32, #tpu.memory_space<vmem>>, %arg5: memref<32x1xf32, #tpu.memory_space<vmem>>, %arg6: memref<32x1xf32, #tpu.memory_space<vmem>>) attributes {dimension_semantics = [#tpu.dimension_semantics<arbitrary>, #tpu.dimension_semantics<arbitrary>], iteration_bounds = array<i64: 2, 1>, scalar_prefetch = 0 : i64, scratch_operands = 0 : i64, tpu.core_type = #tpu.core_type<tc>, window_params = [{transform_indices = @transform_0, window_bounds = array<i64: 1, 4, 256>}, {pipeline_mode = #tpu.pipeline_mode<synchronous>, transform_indices = @transform_1, window_bounds = array<i64: 32, 4>}, {pipeline_mode = #tpu.pipeline_mode<synchronous>, transform_indices = @transform_2, window_bounds = array<i64: 32, 1>}, {pipeline_mode = #tpu.pipeline_mode<synchronous>, transform_indices = @transform_3, window_bounds = array<i64: 32, 1>}, {pipeline_mode = #tpu.pipeline_mode<synchronous>, transform_indices = @transform_4, window_bounds = array<i64: 32, 1>}]} {
    %c0_i32 = arith.constant 0 : i32
    %0 = arith.cmpi eq, %arg0, %c0_i32 : i32
    %c0_i32_0 = arith.constant 0 : i32
    %1 = arith.cmpi eq, %arg1, %c0_i32_0 : i32
    %2 = arith.andi %0, %1 : i1
    %3 = arith.extui %2 : i1 to i32
    %c0_i32_1 = arith.constant 0 : i32
    %4 = arith.cmpi ne, %3, %c0_i32_1 : i32
    scf.if %4 {
      %cst_18 = arith.constant 0.000000e+00 : f32
      %23 = vector.broadcast %cst_18 : f32 to vector<32x1xf32>
      %c0_19 = arith.constant 0 : index
      %c0_20 = arith.constant 0 : index
      %24 = vector.load %arg5[%c0_19, %c0_20] : memref<32x1xf32, #tpu.memory_space<vmem>>, vector<32x1xf32>
      tpu.vector_store %arg5[%c0_19, %c0_20], %23 {strides = array<i32>} : memref<32x1xf32, #tpu.memory_space<vmem>>, vector<32x1xf32>,
      %cst_21 = arith.constant 0.000000e+00 : f32
      %25 = vector.broadcast %cst_21 : f32 to vector<32x1xf32>
      %c0_22 = arith.constant 0 : index
      %c0_23 = arith.constant 0 : index
      %26 = vector.load %arg6[%c0_22, %c0_23] : memref<32x1xf32, #tpu.memory_space<vmem>>, vector<32x1xf32>
      tpu.vector_store %arg6[%c0_22, %c0_23], %25 {strides = array<i32>} : memref<32x1xf32, #tpu.memory_space<vmem>>, vector<32x1xf32>,
    } else {
    }
    %c0 = arith.constant 0 : index
    %c0_2 = arith.constant 0 : index
    %5 = vector.load %arg3[%c0, %c0_2] : memref<32x4xf32, #tpu.memory_space<vmem>>, vector<32x4xf32>
    %c0_3 = arith.constant 0 : index
    %c0_4 = arith.constant 0 : index
    %c0_5 = arith.constant 0 : index
    %6 = vector.load %arg2[%c0_3, %c0_4, %c0_5] : memref<1x4x256xf32, #tpu.memory_space<vmem>>, vector<1x4x256xf32>
    %7 = vector.shape_cast %6 : vector<1x4x256xf32> to vector<4x256xf32>
    %cst = arith.constant dense<0.000000e+00> : vector<32x256xf32>
    %8 = tpu.matmul %5, %7, %cst {dimension_numbers = #tpu.dot_dimension_numbers<[1], [0], [0], [1], [0, 0, 1, 1], [], []>} : vector<32x4xf32>, vector<4x256xf32>, vector<32x256xf32> -> vector<32x256xf32>
    %c0_6 = arith.constant 0 : index
    %c0_7 = arith.constant 0 : index
    %9 = vector.load %arg4[%c0_6, %c0_7] : memref<32x1xf32, #tpu.memory_space<vmem>>, vector<32x1xf32>
    %10 = vector.broadcast %9 : vector<32x1xf32> to vector<32x256xf32>
    %11 = arith.addf %8, %10 : vector<32x256xf32>
    %c0_8 = arith.constant 0 : index
    %c0_9 = arith.constant 0 : index
    %12 = vector.load %arg5[%c0_8, %c0_9] : memref<32x1xf32, #tpu.memory_space<vmem>>, vector<32x1xf32>
    %cst_10 = arith.constant dense<0.000000e+00> : vector<32xf32>
    %13 = vector.multi_reduction <add>, %11, %cst_10 [1] : vector<32x256xf32> to vector<32xf32>
    %14 = vector.shape_cast %13 : vector<32xf32> to vector<32x1xf32>
    %15 = arith.addf %12, %14 : vector<32x1xf32>
    %c0_11 = arith.constant 0 : index
    %c0_12 = arith.constant 0 : index
    %16 = vector.load %arg5[%c0_11, %c0_12] : memref<32x1xf32, #tpu.memory_space<vmem>>, vector<32x1xf32>
    tpu.vector_store %arg5[%c0_11, %c0_12], %15 {strides = array<i32>} : memref<32x1xf32, #tpu.memory_space<vmem>>, vector<32x1xf32>,
    %c0_13 = arith.constant 0 : index
    %c0_14 = arith.constant 0 : index
    %17 = vector.load %arg6[%c0_13, %c0_14] : memref<32x1xf32, #tpu.memory_space<vmem>>, vector<32x1xf32>
    %18 = arith.mulf %11, %11 : vector<32x256xf32>
    %cst_15 = arith.constant dense<0.000000e+00> : vector<32xf32>
    %19 = vector.multi_reduction <add>, %18, %cst_15 [1] : vector<32x256xf32> to vector<32xf32>
    %20 = vector.shape_cast %19 : vector<32xf32> to vector<32x1xf32>
    %21 = arith.addf %17, %20 : vector<32x1xf32>
    %c0_16 = arith.constant 0 : index
    %c0_17 = arith.constant 0 : index
    %22 = vector.load %arg6[%c0_16, %c0_17] : memref<32x1xf32, #tpu.memory_space<vmem>>, vector<32x1xf32>
    tpu.vector_store %arg6[%c0_16, %c0_17], %21 {strides = array<i32>} : memref<32x1xf32, #tpu.memory_space<vmem>>, vector<32x1xf32>,
    return
  }
  func.func @transform_0(%arg0: i32, %arg1: i32) -> (i32, i32, i32) {
    %c0_i32 = arith.constant 0 : i32
    %c0_i32_0 = arith.constant 0 : i32
    return %arg0, %c0_i32, %arg1 : i32, i32, i32
  }
  func.func @transform_1(%arg0: i32, %arg1: i32) -> (i32, i32) {
    %c0_i32 = arith.constant 0 : i32
    %c0_i32_0 = arith.constant 0 : i32
    %c0_i32_1 = arith.constant 0 : i32
    return %c0_i32, %c0_i32_0 : i32, i32
  }
  func.func @transform_2(%arg0: i32, %arg1: i32) -> (i32, i32) {
    %c0_i32 = arith.constant 0 : i32
    %c0_i32_0 = arith.constant 0 : i32
    %c0_i32_1 = arith.constant 0 : i32
    return %c0_i32, %c0_i32_0 : i32, i32
  }
  func.func @transform_3(%arg0: i32, %arg1: i32) -> (i32, i32) {
    %c0_i32 = arith.constant 0 : i32
    %c0_i32_0 = arith.constant 0 : i32
    %c0_i32_1 = arith.constant 0 : i32
    return %c0_i32, %c0_i32_0 : i32, i32
  }
  func.func @transform_4(%arg0: i32, %arg1: i32) -> (i32, i32) {
    %c0_i32 = arith.constant 0 : i32
    %c0_i32_0 = arith.constant 0 : i32
    %c0_i32_1 = arith.constant 0 : i32
    return %c0_i32, %c0_i32_0 : i32, i32
  }
}

</mosaic_0001>

<bundles_post_ra>
// kernel: tpu_custom_call.1
= control target key start
LH: loop header
LB: loop body
LE: loop exit
PB: predicated region body
PF: predicated region fallthrough
CT: control target
= control target key end

     0   :  { %s568_s15 = smov 0   ;;  %s570_s16 = smov 0   ;;  %s706_s0 = inlined_call_operand.vmem [shape: f32[2,4,256], index: 0, kind: input, shape index: {}]   ;;  %s707_s1 = inlined_call_operand.vmem [shape: f32[32,4], index: 1, kind: input, shape index: {}]   ;;  %s708_s2 = inlined_call_operand.vmem [shape: f32[32,1], index: 2, kind: input, shape index: {}]   ;;  %s709_s3 = inlined_call_operand.vmem [shape: f32[32,1], index: 3, kind: output, shape index: {0}]   ;;  %s710_s4 = inlined_call_operand.vmem [shape: f32[32,1], index: 4, kind: output, shape index: {1}]  }
   0x1   :  { %s572_s17 = smov 0  }
   0x2 LB: > { %s27_s18 = sadd.s32 1, %s534_s16  ;;  %p470_p0 = scmp.ge.s32.totalorder %s538_s17, 1  ;;  %s538_s17 = sphi %s572_s17, %s15_s17   ;;  %s534_s16 = sphi %s570_s16, %s712_s16   ;;  %s530_s15 = sphi %s568_s15, %s711_s15  }
   0x3   : > { %p29_p1 = scmp.ge.s32.totalorder %s27_s18, 2  ;;  %p174_p2 = scmp.lt.s32.totalorder %s538_s17, 3 }
   0x5   : > { %s714_s18 = smov (%p29_p1, %s27_s18), 0  ;;  %p175_p3 = pnand %p470_p0, %p174_p2 }
   0x6   : > { %p200_p4 = scmp.lt.s32.totalorder (!%p175_p3), %s530_s15, 1  ;;  %p209_p5 = scmp.eq.s32.totalorder (!%p175_p3), %s530_s15, 0 }
   0x7   : > { %178 = sbr.rel (%p175_p3) target bundleno = 404 (0x194), region = 32 }
   0xe   : > { %s716_s15 = smov (!%p200_p4, %s530_s15), 1  ;;  %214 = sbr.rel (!%p209_p5) target bundleno = 21 (0x15), region = 36 }
   0xf   : > { %s482_s19 = sshll.u32 %s716_s15, 3  ;;  %vm215_vm0 = vcmask (%p209_p5), 7168   ;;  %v540_v0 = vmov (%p209_p5), 0.0  }
  0x10   : > { %s207_s22 = scalar_lea.vmem %s706_s0, %s482_s19  ;;  %216 = vst.msk [vmem:[%s709_s3] sm:$0xff] (%p209_p5), %vm215_vm0, %v540_v0  ;;  %217 = vst.msk [vmem:[%s709_s3 + $0x8] sm:$0xff] (%p209_p5), %vm215_vm0, %v540_v0 }
  0x11   : > { %218 = vst.msk [vmem:[%s709_s3 + $0x10] sm:$0xff] (%p209_p5), %vm215_vm0, %v540_v0  ;;  %219 = vst.msk [vmem:[%s709_s3 + $0x18] sm:$0xff] (%p209_p5), %vm215_vm0, %v540_v0 }
  0x12   : > { %220 = vst.msk [vmem:[%s710_s4] sm:$0xff] (%p209_p5), %vm215_vm0, %v540_v0  ;;  %221 = vst.msk [vmem:[%s710_s4 + $0x8] sm:$0xff] (%p209_p5), %vm215_vm0, %v540_v0 }
  0x13   : > { %222 = vst.msk [vmem:[%s710_s4 + $0x10] sm:$0xff] (%p209_p5), %vm215_vm0, %v540_v0  ;;  %223 = vst.msk [vmem:[%s710_s4 + $0x18] sm:$0xff] (%p209_p5), %vm215_vm0, %v540_v0 }
  0x15 PF: > { %v228_v1 = vld [vmem:[%s207_s22] sm:$0xff]  ;;  %vm268_vm1 = vcmask 1043456   ;;  %v541_v3 = vmov 0.0   ;;  %vm255_vm2 = vcmask 31744   ;;  %v226_v5 = vld [vmem:[%s707_s1 + $0x10] sm:$0xff]  ;;  %v542_v6 = vmov 0  }
  0x16   : > { %v254_v2 = vcombine.high %v228_v1, %v228_v1  ;;  %337 = vmatprep.mubr.f32.mxu0 %v541_v3  ;;  %349 = vmatprep.mubr.f32.mxu1 %v541_v3  ;;  %v224_v4 = vld [vmem:[%s707_s1] sm:$0xff]  ;;  %v231_v8 = vld [vmem:[%s708_s2 + $0x10] sm:$0xff]  ;;  %v225_v9 = vld [vmem:[%s707_s1 + $0x8] sm:$0xff]  ;;  %vm382_vm3 = vcmask 7168  }
  0x17   : > { %513 = vset.pattern.permute.xlu0 %v542_v6  ;;  %514 = vset.pattern.permute.xlu1 %v542_v6  ;;  %v229_v7 = vld [vmem:[%s708_s2] sm:$0xff]  ;;  %v227_v10 = vld [vmem:[%s707_s1 + $0x18] sm:$0xff]  ;;  %v230_v11 = vld [vmem:[%s708_s2 + $0x8] sm:$0xff] }
  0x18   : > { %474 = vmatprep.subr.msk.mxu0 %vm268_vm1, %v254_v2  ;;  %484 = vmatprep.subr.msk.mxu1 %vm268_vm1, %v254_v2  ;;  %v232_v12 = vld [vmem:[%s708_s2 + $0x18] sm:$0xff]  ;;  %v362_v49 = vld [vmem:[%s709_s3] sm:$0xff]  ;;  %v364_v54 = vld [vmem:[%s709_s3 + $0x10] sm:$0xff] }
  0x19   : > { %475 = vmatpush1.msk.msra.mxu0 %vm268_vm1, %v228_v1  ;;  %485 = vmatpush1.msk.msra.mxu1 %vm268_vm1, %v228_v1  ;;  %v387_v51 = vld [vmem:[%s710_s4] sm:$0xff]  ;;  %v363_v57 = vld [vmem:[%s709_s3 + $0x8] sm:$0xff]  ;;  %v365_v60 = vld [vmem:[%s709_s3 + $0x18] sm:$0xff] }
  0x1a   : > { %476 = vmatmul.mubr.msk.f32.vlgmr.msra.gmra.mrb[0].mxu0 %vm255_vm2, %v224_v4  ;;  %478 = vmatmul.mubr.msk.f32.vlgmr.msra.gmra.mrb[0].mxu1 %vm255_vm2, %v226_v5  ;;  %v389_v63 = vld [vmem:[%s710_s4 + $0x10] sm:$0xff]  ;;  %v388_v2 = vld [vmem:[%s710_s4 + $0x8] sm:$0xff]  ;;  %v390_v6 = vld [vmem:[%s710_s4 + $0x18] sm:$0xff] }
  0x1b   : > { %343 = vmatprep.mubr.f32.mxu0 %v541_v3  ;;  %355 = vmatprep.mubr.f32.mxu1 %v541_v3 }
  0x1c   : > { %235 = vperm.xlu0 %513, %v229_v7   ;;  %245 = vperm.xlu1 %514, %v231_v8  }
  0x1e   : > { %477 = vmatmul.mubr.msk.f32.gmra.mrb[2].mxu0 %vm255_vm2, %v225_v9  ;;  %479 = vmatmul.mubr.msk.f32.gmra.mrb[2].mxu1 %vm255_vm2, %v227_v10 }
  0x20   : > { %240 = vperm.xlu0 %513, %v230_v11   ;;  %250 = vperm.xlu1 %514, %v232_v12  }
  0x9b   : > { %v246_v13 = vpop.permute.xlu1 %245  ;;  %v236_v14 = vpop.permute.xlu0 %235 }
  0x9f   : > { %v251_v23 = vpop.permute.xlu1 %250  ;;  %v241_v25 = vpop.permute.xlu0 %240 }
  0xed   : > { %v339_v15 = vpop.f32.mrb[0].mxu0  ;;  %v351_v16 = vpop.f32.mrb[0].mxu1 }
  0xee   : > { %v340_v17 = vadd.f32 %v339_v15, %v236_v14  ;;  %v341_v18 = vpop.f32.mrb[1].mxu0  ;;  %v352_v19 = vadd.f32 %v351_v16, %v246_v13  ;;  %v353_v20 = vpop.f32.mrb[1].mxu1 }
  0xef   : > { %v342_v21 = vadd.f32 %v341_v18, %v236_v14  ;;  %v354_v22 = vadd.f32 %v353_v20, %v246_v13 }
  0xf0   : > { %v391_v24 = vmul.f32 %v340_v17, %v340_v17  ;;  %v395_v26 = vmul.f32 %v352_v19, %v352_v19 }
  0xf1   : > { %v392_v27 = vmul.f32 %v342_v21, %v342_v21  ;;  %v396_v28 = vmul.f32 %v354_v22, %v354_v22  ;;  %v345_v29 = vpop.f32.mrb[2].mxu0  ;;  %v357_v30 = vpop.f32.mrb[2].mxu1  ;;  %v366_v31 = vadd.f32 %v342_v21, %v340_v17  ;;  %v372_v32 = vadd.f32 %v354_v22, %v352_v19 }
  0xf2   : > { %v346_v33 = vadd.f32 %v345_v29, %v241_v25  ;;  %v358_v34 = vadd.f32 %v357_v30, %v251_v23  ;;  %v347_v35 = vpop.f32.mrb[3].mxu0  ;;  %v359_v36 = vpop.f32.mrb[3].mxu1 }
  0xf3   : > { %v348_v37 = vadd.f32 %v347_v35, %v241_v25  ;;  %v360_v38 = vadd.f32 %v359_v36, %v251_v23  ;;  %367 = vadd.xlane.f32.xlu0 %v366_v31  ;;  %v399_v39 = vadd.f32 %v392_v27, %v391_v24  ;;  %v405_v40 = vadd.f32 %v396_v28, %v395_v26 }
  0xf4   : > { %v393_v41 = vmul.f32 %v346_v33, %v346_v33  ;;  %v397_v42 = vmul.f32 %v358_v34, %v358_v34 }
  0xf5   : > { %v394_v43 = vmul.f32 %v348_v37, %v348_v37  ;;  %v398_v44 = vmul.f32 %v360_v38, %v360_v38  ;;  %400 = vadd.xlane.f32.xlu1 %v399_v39  ;;  %v369_v45 = vadd.f32 %v348_v37, %v346_v33  ;;  %v375_v46 = vadd.f32 %v360_v38, %v358_v34 }
  0xf7   : > { %373 = vadd.xlane.f32.xlu0 %v372_v32  ;;  %v402_v47 = vadd.f32 %v394_v43, %v393_v41  ;;  %v408_v48 = vadd.f32 %v398_v44, %v397_v42 }
  0xf9   : > { %370 = vadd.xlane.f32.xlu1 %v369_v45 }
  0xfb   : > { %376 = vadd.xlane.f32.xlu0 %v375_v46 }
  0xfd   : > { %406 = vadd.xlane.f32.xlu1 %v405_v40 }
  0xff   : > { %403 = vadd.xlane.f32.xlu0 %v402_v47 }
 0x103   : > { %409 = vadd.xlane.f32.xlu0 %v408_v48 }
 0x180   : > { %v368_v50 = vpop.xlane.xlu0 %367 }
 0x181   : > { %v378_v52 = vadd.f32 %v368_v50, %v362_v49 }
 0x182   : > { %v401_v53 = vpop.xlane.xlu1 %400 }
 0x183   : > { %383 = vst.msk [vmem:[%s709_s3] sm:$0xff] %vm382_vm3, %v378_v52  ;;  %v411_v55 = vadd.f32 %v401_v53, %v387_v51 }
 0x184   : > { %v374_v56 = vpop.xlane.xlu0 %373 }
 0x185   : > { %415 = vst.msk [vmem:[%s710_s4] sm:$0xff] %vm382_vm3, %v411_v55  ;;  %v380_v58 = vadd.f32 %v374_v56, %v364_v54 }
 0x186   : > { %v371_v59 = vpop.xlane.xlu1 %370 }
 0x187   : > { %385 = vst.msk [vmem:[%s709_s3 + $0x10] sm:$0xff] %vm382_vm3, %v380_v58  ;;  %v379_v61 = vadd.f32 %v371_v59, %v363_v57 }
 0x188   : > { %v377_v62 = vpop.xlane.xlu0 %376 }
 0x189   : > { %384 = vst.msk [vmem:[%s709_s3 + $0x8] sm:$0xff] %vm382_vm3, %v379_v61  ;;  %v381_v0 = vadd.f32 %v377_v62, %v365_v60 }
 0x18a   : > { %v407_v1 = vpop.xlane.xlu1 %406 }
 0x18b   : > { %386 = vst.msk [vmem:[%s709_s3 + $0x18] sm:$0xff] %vm382_vm3, %v381_v0  ;;  %v413_v3 = vadd.f32 %v407_v1, %v389_v63 }
 0x18c   : > { %v404_v4 = vpop.xlane.xlu0 %403 }
 0x18d   : > { %417 = vst.msk [vmem:[%s710_s4 + $0x10] sm:$0xff] %vm382_vm3, %v413_v3  ;;  %v412_v5 = vadd.f32 %v404_v4, %v388_v2 }
 0x18f   : > { %416 = vst.msk [vmem:[%s710_s4 + $0x8] sm:$0xff] %vm382_vm3, %v412_v5 }
 0x190   : > { %v410_v7 = vpop.xlane.xlu0 %409 }
 0x191   : > { %v414_v8 = vadd.f32 %v410_v7, %v390_v6 }
 0x193   : > { %418 = vst.msk [vmem:[%s710_s4 + $0x18] sm:$0xff] %vm382_vm3, %v414_v8 }
 0x194 PF: > { %s15_s17 = sadd.s32 1, %s538_s17   ;;  %s711_s15 = smov %s534_s16 }
 0x195   : > { %p12_p6 = scmp.ge.s32.totalorder %s15_s17, 4   ;;  %s712_s16 = smov %s714_s18 }
 0x197   :  { %14 = sbr.rel (!%p12_p6) target bundleno = 2 (0x2), region = 70 }

</bundles_post_ra>
